<compile_context>
chip_gen: v5e
topology: v5e:2x2
jax: 0.10.0
libtpu: 0.0.40
codegen_flags: <defaults>
</compile_context>

<pallas_src>
import jax
import jax.numpy as jnp
from jax.experimental import pallas as pl
from jax.experimental.pallas import tpu as pltpu


FEAT_DIM = 512
LANE = 128
SUBLANE = 8


def _round_up(x, m):
    return ((x + m - 1) // m) * m


def _fc_kernel(feat_ref, w_ref, b_ref, out_ref):
    # feat_ref: (TB, 512)   w_ref: (512, NC_pad)   b_ref: (1, NC_pad)
    # out_ref : (TB, NC_pad)
    out_ref[...] = (
        jnp.dot(feat_ref[...], w_ref[...], preferred_element_type=jnp.float32)
        + b_ref[...]
    )


def prepare_fc_params(w, b):
    """One-time nn.Linear parameter prep (hoisted out of the per-step forward path).

    w : (num_class, 512) float32  -- PyTorch nn.Linear weight layout
    b : (num_class,)     float32
    Returns:
      w_t   : (512, nc_pad) float32 -- transposed, class dim zero-padded to 128 lanes
      b_row : (1, nc_pad)   float32
    The 128-lane padding makes output stores lane-dense (no masked vst) and the
    pre-transpose guarantees the native (M,K)x(K,N) MXU path with no in-kernel
    transpose of the grid-invariant weight.
    """
    num_class = w.shape[0]
    nc_pad = _round_up(num_class, LANE)
    w_t = jnp.pad(w, ((0, nc_pad - num_class), (0, 0))).T          # (512, nc_pad)
    b_row = jnp.pad(b, (0, nc_pad - num_class)).reshape(1, nc_pad)  # (1, nc_pad)
    return w_t, b_row


def net_forward(x_nchw, w_t, b_row, num_class, *, batch_tile=1024):
    """Pallas implementation of Net.forward (flatten + Linear(512, num_class)).

    x_nchw : (B, 512, 1, 1) float32 -- output of the (untranslated) backbone self.f
    w_t    : (512, nc_pad)  float32 -- from prepare_fc_params
    b_row  : (1, nc_pad)    float32 -- from prepare_fc_params
    returns: (B, num_class) float32
    """
    B = x_nchw.shape[0]
    nc_pad = w_t.shape[1]
    assert x_nchw.shape[1] * x_nchw.shape[2] * x_nchw.shape[3] == FEAT_DIM

    # flatten(start_dim=1): (B, 512, 1, 1) row-major -> (B, 512). Pure reshape.
    feat = x_nchw.reshape(B, FEAT_DIM)

    # Batch tiling:
    #   * tiny B: one full-array block -> no padding, no batch slice, grid=(1,)
    #   * otherwise: >= 2 balanced blocks (multiple of the f32 sublane, 8) so the
    #     "parallel" grid axis shards across both v7x TensorCores and BlockSpec
    #     double-buffering overlaps HBM DMA with the MXU; capped at batch_tile rows
    #     to keep the per-step VMEM footprint small on every generation.
    if B <= 2 * SUBLANE:
        tb = B
    else:
        n_blocks = max(2, pl.cdiv(B, batch_tile))
        tb = min(_round_up(pl.cdiv(B, n_blocks), SUBLANE),
                 _round_up(batch_tile, SUBLANE))
    grid_b = pl.cdiv(B, tb)
    b_pad = grid_b * tb

    if b_pad != B:
        feat = jnp.pad(feat, ((0, b_pad - B), (0, 0)))

    cost = pl.CostEstimate(
        flops=2 * b_pad * FEAT_DIM * nc_pad,
        transcendentals=0,
        bytes_accessed=4 * (b_pad * FEAT_DIM + FEAT_DIM * nc_pad
                            + nc_pad + b_pad * nc_pad),
    )

    out = pl.pallas_call(
        _fc_kernel,
        out_shape=jax.ShapeDtypeStruct((b_pad, nc_pad), jnp.float32),
        grid=(grid_b,),
        in_specs=[
            pl.BlockSpec((tb, FEAT_DIM), lambda i: (i, 0)),       # streamed activations
            pl.BlockSpec((FEAT_DIM, nc_pad), lambda i: (0, 0)),   # resident weight
            pl.BlockSpec((1, nc_pad), lambda i: (0, 0)),          # resident bias
        ],
        out_specs=pl.BlockSpec((tb, nc_pad), lambda i: (i, 0)),
        compiler_params=pltpu.CompilerParams(
            dimension_semantics=("parallel",),
            vmem_limit_bytes=32 << 20,
        ),
        cost_estimate=cost,
    )(feat, w_t, b_row)

    # Slice off padding only when it exists (no extra HBM copies in the common case).
    if b_pad != B:
        out = out[:B]
    if nc_pad != num_class:
        out = out[:, :num_class]
    return out


if __name__ == "__main__":
    B = 2
    num_class = 10

    key = jax.random.PRNGKey(0)
    kx, kw, kb = jax.random.split(key, 3)

    # Backbone output stand-in: (B, 512, 1, 1), NCHW.
    x = jax.random.normal(kx, (B, FEAT_DIM, 1, 1), dtype=jnp.float32)

    # Deterministic nn.Linear(512, num_class) init: U(-1/sqrt(512), 1/sqrt(512)).
    bound = 1.0 / (FEAT_DIM ** 0.5)
    w = jax.random.uniform(kw, (num_class, FEAT_DIM), jnp.float32, -bound, bound)
    b = jax.random.uniform(kb, (num_class,), jnp.float32, -bound, bound)

    # One-time parameter prep (hoisted out of the per-call path).
    w_t, b_row = prepare_fc_params(w, b)
    w_t, b_row = jax.block_until_ready((w_t, b_row))

    out = net_forward(x, w_t, b_row, num_class)
    out = jax.block_until_ready(out)

    # Pure-JAX reference check of the same math.
    ref = x.reshape(B, -1) @ w.T + b
    assert out.shape == (B, num_class)
    assert jnp.allclose(out, ref, atol=1e-5, rtol=1e-5), "mismatch vs reference"

    print("KERNEL_OK")
</pallas_src>

<mosaic_0001>
module attributes {stable_mosaic.version = 11 : i64} {
  func.func @_fc_kernel(%arg0: i32, %arg1: memref<2x512xf32, #tpu.memory_space<vmem>>, %arg2: memref<512x128xf32, #tpu.memory_space<vmem>>, %arg3: memref<1x128xf32, #tpu.memory_space<vmem>>, %arg4: memref<2x128xf32, #tpu.memory_space<vmem>>) attributes {dimension_semantics = [#tpu.dimension_semantics<parallel>], iteration_bounds = array<i64: 1>, scalar_prefetch = 0 : i64, scratch_operands = 0 : i64, tpu.core_type = #tpu.core_type<tc>, window_params = [{transform_indices = @transform_0, window_bounds = array<i64: 2, 512>}, {pipeline_mode = #tpu.pipeline_mode<synchronous>, transform_indices = @transform_1, window_bounds = array<i64: 512, 128>}, {pipeline_mode = #tpu.pipeline_mode<synchronous>, transform_indices = @transform_2, window_bounds = array<i64: 1, 128>}, {transform_indices = @transform_3, window_bounds = array<i64: 2, 128>}]} {
    %c0 = arith.constant 0 : index
    %c0_0 = arith.constant 0 : index
    %0 = vector.load %arg1[%c0, %c0_0] : memref<2x512xf32, #tpu.memory_space<vmem>>, vector<2x512xf32>
    %c0_1 = arith.constant 0 : index
    %c0_2 = arith.constant 0 : index
    %1 = vector.load %arg2[%c0_1, %c0_2] : memref<512x128xf32, #tpu.memory_space<vmem>>, vector<512x128xf32>
    %cst = arith.constant dense<0.000000e+00> : vector<2x128xf32>
    %2 = tpu.matmul %0, %1, %cst {dimension_numbers = #tpu.dot_dimension_numbers<[1], [0], [0], [1], [0, 0, 1, 1], [], []>} : vector<2x512xf32>, vector<512x128xf32>, vector<2x128xf32> -> vector<2x128xf32>
    %c0_3 = arith.constant 0 : index
    %c0_4 = arith.constant 0 : index
    %3 = vector.load %arg3[%c0_3, %c0_4] : memref<1x128xf32, #tpu.memory_space<vmem>>, vector<1x128xf32>
    %4 = vector.broadcast %3 : vector<1x128xf32> to vector<2x128xf32>
    %5 = arith.addf %2, %4 : vector<2x128xf32>
    %c0_5 = arith.constant 0 : index
    %c0_6 = arith.constant 0 : index
    %6 = vector.load %arg4[%c0_5, %c0_6] : memref<2x128xf32, #tpu.memory_space<vmem>>, vector<2x128xf32>
    tpu.vector_store %arg4[%c0_5, %c0_6], %5 {strides = array<i32>} : memref<2x128xf32, #tpu.memory_space<vmem>>, vector<2x128xf32>,
    return
  }
  func.func @transform_0(%arg0: i32) -> (i32, i32) {
    %c0_i32 = arith.constant 0 : i32
    %c0_i32_0 = arith.constant 0 : i32
    return %arg0, %c0_i32 : i32, i32
  }
  func.func @transform_1(%arg0: i32) -> (i32, i32) {
    %c0_i32 = arith.constant 0 : i32
    %c0_i32_0 = arith.constant 0 : i32
    %c0_i32_1 = arith.constant 0 : i32
    return %c0_i32, %c0_i32_0 : i32, i32
  }
  func.func @transform_2(%arg0: i32) -> (i32, i32) {
    %c0_i32 = arith.constant 0 : i32
    %c0_i32_0 = arith.constant 0 : i32
    %c0_i32_1 = arith.constant 0 : i32
    return %c0_i32, %c0_i32_0 : i32, i32
  }
  func.func @transform_3(%arg0: i32) -> (i32, i32) {
    %c0_i32 = arith.constant 0 : i32
    %c0_i32_0 = arith.constant 0 : i32
    return %arg0, %c0_i32 : i32, i32
  }
}

</mosaic_0001>

<bundles_post_ra>
// kernel: tpu_custom_call.1
= control target key start
LH: loop header
LB: loop body
LE: loop exit
PB: predicated region body
PF: predicated region fallthrough
CT: control target
= control target key end

     0   :  { %8 = vsyncpa [#allocation3], 0  ;;  %s344_s0 = inlined_call_operand.hbm [shape: f32[2,512], index: 0, kind: input, shape index: {}]   ;;  %s345_s1 = inlined_call_operand.hbm [shape: f32[512,128], index: 1, kind: input, shape index: {}]   ;;  %s346_s2 = inlined_call_operand.vmem [shape: f32[1,128], index: 2, kind: input, shape index: {}]   ;;  %s347_s3 = inlined_call_operand.hbm [shape: f32[2,128], index: 3, kind: output, shape index: {}]  }
   0x1   :  { %9 = vsyncpa [#allocation6], 0 }
   0x2   :  { %10 = vsyncpa [#allocation4], 0  ;;  %s16_s14 = sshll.u32 %s344_s0, 4  ;;  %s307_s15 = smov [#allocation2]   ;;  %s17_s14 = int_to_ptr.hbm [resolvable:$true] %s16_s14 }
   0x3   :  { %s18_s16 = sshll.u32 %s307_s15, 4  ;;  %s26_s19 = sshll.u32 %s345_s1, 4  ;;  %s19_s16 = int_to_ptr.vmem [resolvable:$true] %s18_s16  ;;  %s27_s19 = int_to_ptr.hbm [resolvable:$true] %s26_s19 }
   0x4   :  { %21 = dma.hbm_to_vmem [thread:$0]  %s17_s14, 128, %s19_s16, [#allocation3]  }
   0x5   :  { %s308_s20 = smov [#allocation5]   ;;  %s309_s22 = smov 128  }
   0x6   :  { %s28_s21 = sshll.u32 %s308_s20, 4  ;;  %s310_s23 = smov 8   ;;  %s29_s21 = int_to_ptr.vmem [resolvable:$true] %s28_s21 }
   0x7   :  { %34 = dma.hbm_to_vmem [thread:$0]  %s27_s19, 8192, %s29_s21, [#allocation6], %s309_s22, %s309_s22, %s310_s23  }
   0x8   :  { %301 = dma.done.wait [#allocation3], 128  }
   0x9   :  { %302 = vsyncadd [#allocation3], 4294967168 }
   0xa   :  { %303 = dma.done.wait [#allocation6], 8192  }
   0xb   :  { %304 = vsyncadd [#allocation6], 4294959104  ;;  %v93_v0 = vld [vmem:[#allocation5 + $0x178] sm:$0xff]  ;;  %v92_v2 = vld [vmem:[#allocation5 + $0x170] sm:$0xff]  ;;  %s311_s24 = smov [#allocation7]   ;;  %s212_s28 = sshll.u32 %s347_s3, 4  ;;  %s213_s28 = int_to_ptr.hbm [resolvable:$true] %s212_s28 }
   0xc   :  { %v61_v1 = vld [vmem:[#allocation5 + $0x78] sm:$0xff]  ;;  %164 = vmatpush.msra.mxu2 %v93_v0  ;;  %v60_v4 = vld [vmem:[#allocation5 + $0x70] sm:$0xff]  ;;  %v91_v6 = vld [vmem:[#allocation5 + $0x168] sm:$0xff]  ;;  %s210_s25 = sshll.u32 %s311_s24, 4  ;;  %s211_s25 = int_to_ptr.vmem [resolvable:$true] %s210_s25 }
   0xd   :  { %124 = vmatpush.msra.mxu0 %v61_v1  ;;  %v109_v3 = vld [vmem:[#allocation5 + $0x1f8] sm:$0xff]  ;;  %v108_v7 = vld [vmem:[#allocation5 + $0x1f0] sm:$0xff]  ;;  %v59_v8 = vld [vmem:[#allocation5 + $0x68] sm:$0xff] }
   0xe   :  { %v77_v5 = vld [vmem:[#allocation5 + $0xf8] sm:$0xff]  ;;  %184 = vmatpush.msra.mxu3 %v109_v3  ;;  %165 = vmatpush.msra.mxu2 %v92_v2  ;;  %v76_v9 = vld [vmem:[#allocation5 + $0xf0] sm:$0xff]  ;;  %v107_v10 = vld [vmem:[#allocation5 + $0x1e8] sm:$0xff] }
   0xf   :  { %144 = vmatpush.msra.mxu1 %v77_v5  ;;  %125 = vmatpush.msra.mxu0 %v60_v4  ;;  %v90_v11 = vld [vmem:[#allocation5 + $0x160] sm:$0xff]  ;;  %v75_v13 = vld [vmem:[#allocation5 + $0xe8] sm:$0xff]  ;;  %v89_v16 = vld [vmem:[#allocation5 + $0x158] sm:$0xff] }
  0x10   :  { %185 = vmatpush.msra.mxu3 %v108_v7  ;;  %v58_v12 = vld [vmem:[#allocation5 + $0x60] sm:$0xff]  ;;  %166 = vmatpush.msra.mxu2 %v91_v6  ;;  %v57_v17 = vld [vmem:[#allocation5 + $0x58] sm:$0xff]  ;;  %v88_v20 = vld [vmem:[#allocation5 + $0x150] sm:$0xff] }
  0x11   :  { %145 = vmatpush.msra.mxu1 %v76_v9  ;;  %126 = vmatpush.msra.mxu0 %v59_v8  ;;  %v106_v14 = vld [vmem:[#allocation5 + $0x1e0] sm:$0xff]  ;;  %v105_v18 = vld [vmem:[#allocation5 + $0x1d8] sm:$0xff]  ;;  %v56_v21 = vld [vmem:[#allocation5 + $0x50] sm:$0xff] }
  0x12   :  { %v74_v15 = vld [vmem:[#allocation5 + $0xe0] sm:$0xff]  ;;  %186 = vmatpush.msra.mxu3 %v107_v10  ;;  %167 = vmatpush.msra.mxu2 %v90_v11  ;;  %v73_v19 = vld [vmem:[#allocation5 + $0xd8] sm:$0xff]  ;;  %v104_v22 = vld [vmem:[#allocation5 + $0x1d0] sm:$0xff] }
  0x13   :  { %146 = vmatpush.msra.mxu1 %v75_v13  ;;  %127 = vmatpush.msra.mxu0 %v58_v12  ;;  %v72_v23 = vld [vmem:[#allocation5 + $0xd0] sm:$0xff]  ;;  %v87_v24 = vld [vmem:[#allocation5 + $0x148] sm:$0xff]  ;;  %v86_v28 = vld [vmem:[#allocation5 + $0x140] sm:$0xff] }
  0x14   :  { %187 = vmatpush.msra.mxu3 %v106_v14  ;;  %168 = vmatpush.msra.mxu2 %v89_v16  ;;  %v55_v25 = vld [vmem:[#allocation5 + $0x48] sm:$0xff]  ;;  %v54_v29 = vld [vmem:[#allocation5 + $0x40] sm:$0xff]  ;;  %v85_v32 = vld [vmem:[#allocation5 + $0x138] sm:$0xff] }
  0x15   :  { %147 = vmatpush.msra.mxu1 %v74_v15  ;;  %128 = vmatpush.msra.mxu0 %v57_v17  ;;  %v103_v26 = vld [vmem:[#allocation5 + $0x1c8] sm:$0xff]  ;;  %v102_v30 = vld [vmem:[#allocation5 + $0x1c0] sm:$0xff]  ;;  %v53_v33 = vld [vmem:[#allocation5 + $0x38] sm:$0xff] }
  0x16   :  { %188 = vmatpush.msra.mxu3 %v105_v18  ;;  %169 = vmatpush.msra.mxu2 %v88_v20  ;;  %v71_v27 = vld [vmem:[#allocation5 + $0xc8] sm:$0xff]  ;;  %v70_v31 = vld [vmem:[#allocation5 + $0xc0] sm:$0xff]  ;;  %v101_v34 = vld [vmem:[#allocation5 + $0x1b8] sm:$0xff] }
  0x17   :  { %148 = vmatpush.msra.mxu1 %v73_v19  ;;  %129 = vmatpush.msra.mxu0 %v56_v21  ;;  %v69_v35 = vld [vmem:[#allocation5 + $0xb8] sm:$0xff]  ;;  %v84_v36 = vld [vmem:[#allocation5 + $0x130] sm:$0xff]  ;;  %v83_v40 = vld [vmem:[#allocation5 + $0x128] sm:$0xff] }
  0x18   :  { %189 = vmatpush.msra.mxu3 %v104_v22  ;;  %170 = vmatpush.msra.mxu2 %v87_v24  ;;  %v52_v37 = vld [vmem:[#allocation5 + $0x30] sm:$0xff]  ;;  %v51_v41 = vld [vmem:[#allocation5 + $0x28] sm:$0xff]  ;;  %v82_v44 = vld [vmem:[#allocation5 + $0x120] sm:$0xff] }
  0x19   :  { %149 = vmatpush.msra.mxu1 %v72_v23  ;;  %130 = vmatpush.msra.mxu0 %v55_v25  ;;  %v100_v38 = vld [vmem:[#allocation5 + $0x1b0] sm:$0xff]  ;;  %v99_v42 = vld [vmem:[#allocation5 + $0x1a8] sm:$0xff]  ;;  %v50_v45 = vld [vmem:[#allocation5 + $0x20] sm:$0xff] }
  0x1a   :  { %190 = vmatpush.msra.mxu3 %v103_v26  ;;  %171 = vmatpush.msra.mxu2 %v86_v28  ;;  %v68_v39 = vld [vmem:[#allocation5 + $0xb0] sm:$0xff]  ;;  %v67_v43 = vld [vmem:[#allocation5 + $0xa8] sm:$0xff]  ;;  %v45_v46 = vld [vmem:[#allocation2] sm:$0xff] }
  0x1b   :  { %150 = vmatpush.msra.mxu1 %v71_v27  ;;  %131 = vmatpush.msra.mxu0 %v54_v29  ;;  %v98_v47 = vld [vmem:[#allocation5 + $0x1a0] sm:$0xff]  ;;  %115 = vst [vmem:[#allocation1] ss:$4 sm:$0xff] %v45_v46  ;;  %v81_v49 = vld [vmem:[#allocation5 + $0x118] sm:$0xff]  ;;  %v80_v53 = vld [vmem:[#allocation5 + $0x110] sm:$0xff] }
  0x1c   :  { %191 = vmatpush.msra.mxu3 %v102_v30  ;;  %172 = vmatpush.msra.mxu2 %v85_v32  ;;  %v66_v48 = vld [vmem:[#allocation5 + $0xa0] sm:$0xff]  ;;  %v49_v50 = vld [vmem:[#allocation5 + $0x18] sm:$0xff]  ;;  %v48_v54 = vld [vmem:[#allocation5 + $0x10] sm:$0xff] }
  0x1d   :  { %151 = vmatpush.msra.mxu1 %v70_v31  ;;  %132 = vmatpush.msra.mxu0 %v53_v33  ;;  %v97_v51 = vld [vmem:[#allocation5 + $0x198] sm:$0xff]  ;;  %v96_v55 = vld [vmem:[#allocation5 + $0x190] sm:$0xff]  ;;  %v79_v57 = vld [vmem:[#allocation5 + $0x108] sm:$0xff] }
  0x1e   :  { %192 = vmatpush.msra.mxu3 %v101_v34  ;;  %173 = vmatpush.msra.mxu2 %v84_v36  ;;  %v65_v52 = vld [vmem:[#allocation5 + $0x98] sm:$0xff]  ;;  %v64_v56 = vld [vmem:[#allocation5 + $0x90] sm:$0xff]  ;;  %v47_v58 = vld [vmem:[#allocation5 + $0x8] sm:$0xff] }
  0x1f   :  { %152 = vmatpush.msra.mxu1 %v69_v35  ;;  %133 = vmatpush.msra.mxu0 %v52_v37  ;;  %v95_v59 = vld [vmem:[#allocation5 + $0x188] sm:$0xff]  ;;  %v78_v61 = vld [vmem:[#allocation5 + $0x100] sm:$0xff]  ;;  %v228_v5 = vld [vmem:[%s346_s2] ss:$0 sm:$0xff] }
  0x20   :  { %193 = vmatpush.msra.mxu3 %v100_v38  ;;  %174 = vmatpush.msra.mxu2 %v83_v40  ;;  %v63_v60 = vld [vmem:[#allocation5 + $0x88] sm:$0xff]  ;;  %v46_v62 = vld [vmem:[#allocation5] sm:$0xff] }
  0x21   :  { %153 = vmatpush.msra.mxu1 %v68_v39  ;;  %134 = vmatpush.msra.mxu0 %v51_v41  ;;  %v94_v0 = vld [vmem:[#allocation5 + $0x180] sm:$0xff] }
  0x22   :  { %194 = vmatpush.msra.mxu3 %v99_v42  ;;  %175 = vmatpush.msra.mxu2 %v82_v44  ;;  %v118_v63 = vld.sshfl [vmem:[#allocation1 + $0x10] sm:$0xff pattern:$0x73625140]  ;;  %v116_v1 = vld.sshfl [vmem:[#allocation1] sm:$0xff pattern:$0x73625140] }
  0x23   :  { %154 = vmatpush.msra.mxu1 %v67_v43  ;;  %135 = vmatpush.msra.mxu0 %v50_v45  ;;  %v119_v2 = vld.sshfl [vmem:[#allocation1 + $0x18] sm:$0xff pattern:$0x73625140]  ;;  %v62_v3 = vld [vmem:[#allocation5 + $0x80] sm:$0xff] }
  0x24   :  { %195 = vmatpush.msra.mxu3 %v98_v47  ;;  %176 = vmatpush.msra.mxu2 %v81_v49  ;;  %v117_v4 = vld.sshfl [vmem:[#allocation1 + $0x8] sm:$0xff pattern:$0x73625140] }
  0x25   :  { %155 = vmatpush.msra.mxu1 %v66_v48  ;;  %136 = vmatpush.msra.mxu0 %v49_v50 }
  0x26   :  { %196 = vmatpush.msra.mxu3 %v97_v51  ;;  %177 = vmatpush.msra.mxu2 %v80_v53 }
  0x27   :  { %156 = vmatpush.msra.mxu1 %v65_v52  ;;  %137 = vmatpush.msra.mxu0 %v48_v54 }
  0x28   :  { %197 = vmatpush.msra.mxu3 %v96_v55  ;;  %178 = vmatpush.msra.mxu2 %v79_v57 }
  0x29   :  { %157 = vmatpush.msra.mxu1 %v64_v56  ;;  %138 = vmatpush.msra.mxu0 %v47_v58 }
  0x2a   :  { %198 = vmatpush.msra.mxu3 %v95_v59  ;;  %179 = vmatpush.msra.mxu2 %v78_v61 }
  0x2b   :  { %158 = vmatpush.msra.mxu1 %v63_v60  ;;  %139 = vmatpush.msra.mxu0 %v46_v62 }
  0x2c   :  { %180 = vmatmul.f32.vlgmr.msra.gmra.mxu2 %v118_v63  ;;  %199 = vmatpush.msra.mxu3 %v94_v0 }
  0x2d   :  { %140 = vmatmul.f32.vlgmr.msra.gmra.mxu0 %v116_v1  ;;  %200 = vmatmul.f32.vlgmr.msra.gmra.mxu3 %v119_v2 }
  0x2e   :  { %159 = vmatpush.msra.mxu1 %v62_v3 }
  0x2f   :  { %160 = vmatmul.f32.vlgmr.msra.gmra.mxu1 %v117_v4 }
  0xaa   :  { %v141_v6 = vpop.f32.mrf.mxu0 }
  0xab   :  { %v142_v7 = vadd.f32 %v228_v5, %v141_v6 }
  0xac   :  { %v161_v8 = vpop.f32.mrf.mxu1 }
  0xad   :  { %v162_v9 = vadd.f32 %v161_v8, %v142_v7 }
  0xaf   :  { %v181_v10 = vpop.f32.mrf.mxu2 }
  0xb0   :  { %v182_v11 = vadd.f32 %v181_v10, %v162_v9  ;;  %v201_v12 = vpop.f32.mrf.mxu3 }
  0xb2   :  { %v202_v13 = vadd.f32 %v201_v12, %v182_v11 }
  0xb4   :  { %204 = vst [vmem:[#allocation7] sm:$0x3] %v202_v13 }
  0xb5   :  { %215 = dma.vmem_to_hbm [thread:$0]  %s211_s25, 32, %s213_s28, [#allocation4]  }
  0xb6   :  { %305 = dma.done.wait [#allocation4], 32  }
  0xb7   :  { %306 = vsyncadd [#allocation4], 4294967264 }
  0xb8   :  { %220 = vsyncpa [#allocation3], 1 }
  0xb9   :  { %221 = vsyncpa [#allocation6], 1 }
  0xba   :  { %222 = vsyncpa [#allocation4], 1 }

</bundles_post_ra>
